<compile_context>
chip_gen: v6e
topology: v6e:2x2x1
jax: 0.10.0
libtpu: 0.0.40
codegen_flags: <defaults>
</compile_context>

<pallas_src>
import functools

import jax
import jax.numpy as jnp
from jax.experimental import pallas as pl
from jax.experimental.pallas import tpu as pltpu


def _round_up(x, m):
    return (x + m - 1) // m * m


def _choose_batch_tile(b, *, max_tile=512, min_tile_for_split=256):
    """Adaptive batch tile (rows), multiple of 16, <= max_tile rows."""
    # Enough tiles that no tile exceeds max_tile rows.
    n_tiles = pl.cdiv(b, max_tile)
    # v7x has two TensorCores: prefer >= 2 tiles so the "parallel" batch axis
    # actually shards across them — but never shrink tiles below
    # min_tile_for_split rows purely for that (v5e/v6e have a single TC).
    if n_tiles < 2 and b >= 2 * min_tile_for_split:
        n_tiles = 2
    return _round_up(max(pl.cdiv(b, n_tiles), 1), 16)


def mlp_kernel(x_ref, w1_ref, w2_ref, o_ref):
    # x_ref:  (B_TILE, D)      f32 batch tile (cast to bf16 in-kernel)
    # w1_ref: (D, H_pad)       bf16 linear1 weight, MXU-native (K, N) layout
    # w2_ref: (H_pad, C_pad)   bf16 linear2 weight, MXU-native (K, N) layout
    # o_ref:  (B_TILE, C_pad)  f32 logits, lane-dense (C_pad % 128 == 0)
    x_bf16 = x_ref[...].astype(jnp.bfloat16)          # in-kernel cast (VPU)
    h = jnp.dot(x_bf16, w1_ref[...],
                preferred_element_type=jnp.float32)    # (B_TILE, H_pad)
    out = jnp.dot(h.astype(jnp.bfloat16), w2_ref[...],
                  preferred_element_type=jnp.float32)  # (B_TILE, C_pad)
    o_ref[...] = out.astype(o_ref.dtype)


def prepare_mlp_params(w1, w2):
    """One-time parameter prep; keep OUT of the per-step forward path.

    w1: (hidden, D), w2: (num_classes, hidden) — nn.Linear (out, in) layout.
    Casts to bf16, transposes to MXU-native (K, N) layout, and zero-pads the
    hidden / class dims to multiples of 128.  Exact: padded hidden units are
    zero, padded classes are sliced off later.
    """
    hid, d = w1.shape
    c, hid2 = w2.shape
    assert hid == hid2
    hid_pad = _round_up(hid, 128)
    c_pad = _round_up(c, 128)
    w1p = jnp.zeros((d, hid_pad), jnp.bfloat16).at[:, :hid].set(
        w1.T.astype(jnp.bfloat16))                     # (D, H_pad)
    w2p = jnp.zeros((hid_pad, c_pad), jnp.bfloat16).at[:hid, :c].set(
        w2.T.astype(jnp.bfloat16))                     # (H_pad, C_pad)
    return w1p, w2p, c


@functools.partial(jax.jit, static_argnames=("num_classes",))
def mlp_forward(x_nchw, w1p, w2p, num_classes):
    """x_nchw: (B, C, H, W) f32; w1p/w2p from prepare_mlp_params."""
    b = x_nchw.shape[0]
    d = x_nchw.shape[1] * x_nchw.shape[2] * x_nchw.shape[3]
    hidden = w1p.shape[0]  # == d (contracting dim of first matmul)
    hid_pad = w1p.shape[1]
    c_pad = w2p.shape[1]

    # Flatten like torch .view (same element order); stays f32 on the DMA path
    # (bf16 cast happens inside the kernel).
    x_flat = x_nchw.reshape(b, d)

    b_tile = _choose_batch_tile(b)
    b_pad = _round_up(b, b_tile)
    if b_pad != b:
        x_flat = jnp.pad(x_flat, ((0, b_pad - b), (0, 0)))
    n_tiles = b_pad // b_tile

    # Advisory cost: true (unpadded) FLOPs, f32 x traffic, bf16 weights.
    cost = pl.CostEstimate(
        flops=2 * b * d * min(hid_pad, hidden) + 2 * b * hid_pad * num_classes,
        transcendentals=0,
        bytes_accessed=(x_flat.size * 4 + w1p.size * 2 + w2p.size * 2
                        + b_pad * c_pad * 4),
    )

    out_padded = pl.pallas_call(
        mlp_kernel,
        out_shape=jax.ShapeDtypeStruct((b_pad, c_pad), jnp.float32),
        grid_spec=pltpu.PrefetchScalarGridSpec(
            num_scalar_prefetch=0,
            grid=(n_tiles,),
            in_specs=[
                # x batch tile: pipelined (default double-buffered).
                pl.BlockSpec((b_tile, d), lambda i: (i, 0)),
                # Grid-invariant weights: VMEM-resident, single-buffered.
                pl.BlockSpec((d, hid_pad), lambda i: (0, 0),
                             pipeline_mode=pl.Buffered(1)),
                pl.BlockSpec((hid_pad, c_pad), lambda i: (0, 0),
                             pipeline_mode=pl.Buffered(1)),
            ],
            out_specs=pl.BlockSpec((b_tile, c_pad), lambda i: (i, 0)),
        ),
        compiler_params=pltpu.CompilerParams(
            dimension_semantics=("parallel",)),
        cost_estimate=cost,
    )(x_flat, w1p, w2p)

    return out_padded[:b, :num_classes]


if __name__ == "__main__":
    # dataset_cfg / model_cfg / cfg analogue (small synthetic sizes)
    image_size = 16
    num_channels = 4
    num_classes = 10
    default_width = 32
    width_factor = 1.0

    in_dim = num_channels * image_size ** 2           # 1024
    hidden = int(default_width * width_factor)        # 32
    batch = 2

    key = jax.random.PRNGKey(0)
    kx, k1, k2 = jax.random.split(key, 3)

    # deterministic synthetic parameters (shapes match nn.Linear: (out, in))
    x = jax.random.normal(kx, (batch, num_channels, image_size, image_size),
                          dtype=jnp.float32)
    w1 = jax.random.normal(k1, (hidden, in_dim), dtype=jnp.float32) * (in_dim ** -0.5)
    w2 = jax.random.normal(k2, (num_classes, hidden), dtype=jnp.float32) * (hidden ** -0.5)

    # One-time parameter prep (cast + transpose + pad) — outside the hot path.
    w1p, w2p, n_cls = prepare_mlp_params(w1, w2)

    out = mlp_forward(x, w1p, w2p, n_cls)
    out = jax.block_until_ready(out)

    # Reference (f32, PyTorch semantics). Kernel runs the data path in bf16
    # with f32 accumulation, so use a bf16-appropriate tolerance.
    ref = (x.reshape(batch, in_dim) @ w1.T) @ w2.T
    assert out.shape == (batch, num_classes)
    assert jnp.allclose(out, ref, atol=5e-2, rtol=5e-2), (
        float(jnp.max(jnp.abs(out - ref))))

    print("KERNEL_OK")
</pallas_src>

<mosaic_0001>
module attributes {stable_mosaic.version = 11 : i64} {
  func.func @mlp_kernel(%arg0: i32, %arg1: memref<16x1024xf32, #tpu.memory_space<vmem>>, %arg2: memref<1024x128xbf16, #tpu.memory_space<vmem>>, %arg3: memref<128x128xbf16, #tpu.memory_space<vmem>>, %arg4: memref<16x128xf32, #tpu.memory_space<vmem>>) attributes {dimension_semantics = [#tpu.dimension_semantics<parallel>], iteration_bounds = array<i64: 1>, scalar_prefetch = 0 : i64, scratch_operands = 0 : i64, tpu.core_type = #tpu.core_type<tc>, window_params = [{transform_indices = @transform_0, window_bounds = array<i64: 16, 1024>}, {pipeline_mode = #tpu.pipeline_mode<synchronous>, transform_indices = @transform_1, window_bounds = array<i64: 1024, 128>}, {pipeline_mode = #tpu.pipeline_mode<synchronous>, transform_indices = @transform_2, window_bounds = array<i64: 128, 128>}, {transform_indices = @transform_3, window_bounds = array<i64: 16, 128>}]} {
    %c0 = arith.constant 0 : index
    %c0_0 = arith.constant 0 : index
    %0 = vector.load %arg1[%c0, %c0_0] : memref<16x1024xf32, #tpu.memory_space<vmem>>, vector<16x1024xf32>
    %1 = arith.truncf %0 : vector<16x1024xf32> to vector<16x1024xbf16>
    %c0_1 = arith.constant 0 : index
    %c0_2 = arith.constant 0 : index
    %2 = vector.load %arg2[%c0_1, %c0_2] : memref<1024x128xbf16, #tpu.memory_space<vmem>>, vector<1024x128xbf16>
    %cst = arith.constant dense<0.000000e+00> : vector<16x128xf32>
    %3 = tpu.matmul %1, %2, %cst {dimension_numbers = #tpu.dot_dimension_numbers<[1], [0], [0], [1], [0, 0, 1, 1], [], []>} : vector<16x1024xbf16>, vector<1024x128xbf16>, vector<16x128xf32> -> vector<16x128xf32>
    %4 = arith.truncf %3 : vector<16x128xf32> to vector<16x128xbf16>
    %c0_3 = arith.constant 0 : index
    %c0_4 = arith.constant 0 : index
    %5 = vector.load %arg3[%c0_3, %c0_4] : memref<128x128xbf16, #tpu.memory_space<vmem>>, vector<128x128xbf16>
    %cst_5 = arith.constant dense<0.000000e+00> : vector<16x128xf32>
    %6 = tpu.matmul %4, %5, %cst_5 {dimension_numbers = #tpu.dot_dimension_numbers<[1], [0], [0], [1], [0, 0, 1, 1], [], []>} : vector<16x128xbf16>, vector<128x128xbf16>, vector<16x128xf32> -> vector<16x128xf32>
    %c0_6 = arith.constant 0 : index
    %c0_7 = arith.constant 0 : index
    %7 = vector.load %arg4[%c0_6, %c0_7] : memref<16x128xf32, #tpu.memory_space<vmem>>, vector<16x128xf32>
    tpu.vector_store %arg4[%c0_6, %c0_7], %6 {strides = array<i32>} : memref<16x128xf32, #tpu.memory_space<vmem>>, vector<16x128xf32>,
    return
  }
  func.func @transform_0(%arg0: i32) -> (i32, i32) {
    %c0_i32 = arith.constant 0 : i32
    %c0_i32_0 = arith.constant 0 : i32
    return %arg0, %c0_i32 : i32, i32
  }
  func.func @transform_1(%arg0: i32) -> (i32, i32) {
    %c0_i32 = arith.constant 0 : i32
    %c0_i32_0 = arith.constant 0 : i32
    %c0_i32_1 = arith.constant 0 : i32
    return %c0_i32, %c0_i32_0 : i32, i32
  }
  func.func @transform_2(%arg0: i32) -> (i32, i32) {
    %c0_i32 = arith.constant 0 : i32
    %c0_i32_0 = arith.constant 0 : i32
    %c0_i32_1 = arith.constant 0 : i32
    return %c0_i32, %c0_i32_0 : i32, i32
  }
  func.func @transform_3(%arg0: i32) -> (i32, i32) {
    %c0_i32 = arith.constant 0 : i32
    %c0_i32_0 = arith.constant 0 : i32
    return %arg0, %c0_i32 : i32, i32
  }
}

</mosaic_0001>

<bundles_post_ra>
// kernel: mlp_forward.1
= control target key start
LH: loop header
LB: loop body
LE: loop exit
PB: predicated region body
PF: predicated region fallthrough
CT: control target
= control target key end

     0   :  { %8 = vsyncpa [#allocation3], 0  ;;  %s1130_s12 = smov [#allocation2]   ;;  %s1236_s0 = inlined_call_operand.vmem [shape: f32[16,1024], index: 0, kind: input, shape index: {}]   ;;  %s1237_s1 = inlined_call_operand.hbm [shape: bf16[1024,128], index: 1, kind: input, shape index: {}]   ;;  %s1238_s2 = inlined_call_operand.vmem [shape: bf16[128,128], index: 2, kind: input, shape index: {}]   ;;  %s1239_s3 = inlined_call_operand.vmem [shape: f32[16,128], index: 3, kind: output, shape index: {}]  }
   0x1   :  { %s16_s13 = sshll.u32 %s1130_s12, 4  ;;  %s17_s13 = int_to_ptr.vmem [resolvable:$true] %s16_s13 }
   0x2   :  { %s1116_s14 = scalar_lea.vmem %s17_s13, 8192  ;;  %p1121_p1 = scmp.lt.s32.totalorder %s17_s13, %s17_s13 }
   0x3   :  { %p1117_p0 = scmp.ne.s32.totalorder %s17_s13, %s1116_s14  ;;  %p1122_p2 = scmp.lt.s32.totalorder %s1116_s14, %s1116_s14 }
   0x5   :  { %p1123_p3 = por %p1122_p2, %p1121_p1 }
   0x7   :  { %p1124_p4 = pnand %p1123_p3, %p1117_p0 }
   0x9   :  { %1127 = shalt.err (!%p1124_p4)
}
   0xa   :  { %s1131_s15 = smov 64   ;;  %s1132_s16 = smov 4  }
   0xb   :  { %22 = dma.hbm_to_vmem [thread:$0]  %s1237_s1, 8192, %s17_s13, [#allocation3], %s1131_s15, %s1131_s15, %s1132_s16  }
   0xc   :  { %1128 = dma.done.wait [#allocation3], 8192  }
   0xd   :  { %1129 = vsyncadd [#allocation3], 4294959104  ;;  %v1036_v0 = vld [vmem:[#allocation2 + $0x78] sm:$0xff]   ;;  %v1040_v4 = vld [vmem:[#allocation2 + $0x70] sm:$0xff]   ;;  %vm1134_vm0 = vmmov 0  }
   0xe   :  { %v1037_v1 = vld [vmem:[#allocation2 + $0xf8] sm:$0xff]   ;;  %914 = vmatprep.subr.bf16.mxu0 %v1036_v0  ;;  %v1041_v5 = vld [vmem:[#allocation2 + $0xf0] sm:$0xff]   ;;  %v1044_v8 = vld [vmem:[#allocation2 + $0x68] sm:$0xff]  }
   0xf   :  { %v1038_v2 = vld [vmem:[#allocation2 + $0x38] sm:$0xff]   ;;  %936 = vmatprep.subr.bf16.mxu1 %v1037_v1  ;;  %v1042_v6 = vld [vmem:[#allocation2 + $0x30] sm:$0xff]   ;;  %v1045_v9 = vld [vmem:[#allocation2 + $0xe8] sm:$0xff]  }
  0x10   :  { %v1039_v3 = vld [vmem:[#allocation2 + $0xb8] sm:$0xff]   ;;  %915 = vmatpush3.bf16.msra.mxu0 %v1038_v2  ;;  %v1043_v7 = vld [vmem:[#allocation2 + $0xb0] sm:$0xff]   ;;  %v1046_v10 = vld [vmem:[#allocation2 + $0x28] sm:$0xff]  }
  0x11   :  { %937 = vmatpush3.bf16.msra.mxu1 %v1039_v3  ;;  %916 = vmatprep.subr.bf16.mxu0 %v1040_v4  ;;  %v1047_v11 = vld [vmem:[#allocation2 + $0xa8] sm:$0xff]   ;;  %v1048_v12 = vld [vmem:[#allocation2 + $0x60] sm:$0xff]   ;;  %v1052_v16 = vld [vmem:[#allocation2 + $0x58] sm:$0xff]  }
  0x12   :  { %938 = vmatprep.subr.bf16.mxu1 %v1041_v5  ;;  %v1049_v13 = vld [vmem:[#allocation2 + $0xe0] sm:$0xff]   ;;  %v1053_v17 = vld [vmem:[#allocation2 + $0xd8] sm:$0xff]   ;;  %v1056_v20 = vld [vmem:[#allocation2 + $0x50] sm:$0xff]  }
  0x13   :  { %v1050_v14 = vld [vmem:[#allocation2 + $0x20] sm:$0xff]   ;;  %v1054_v18 = vld [vmem:[#allocation2 + $0x18] sm:$0xff]   ;;  %v1057_v21 = vld [vmem:[#allocation2 + $0xd0] sm:$0xff]  }
  0x14   :  { %917 = vmatpush3.bf16.msra.mxu0 %v1042_v6  ;;  %v1051_v15 = vld [vmem:[#allocation2 + $0xa0] sm:$0xff]   ;;  %v1055_v19 = vld [vmem:[#allocation2 + $0x98] sm:$0xff]   ;;  %v1058_v22 = vld [vmem:[#allocation2 + $0x10] sm:$0xff]  }
  0x15   :  { %939 = vmatpush3.bf16.msra.mxu1 %v1043_v7  ;;  %918 = vmatprep.subr.bf16.mxu0 %v1044_v8  ;;  %v1059_v23 = vld [vmem:[#allocation2 + $0x90] sm:$0xff]   ;;  %v1060_v24 = vld [vmem:[#allocation2 + $0x48] sm:$0xff]   ;;  %v1064_v28 = vld [vmem:[#allocation2 + $0x40] sm:$0xff]  }
  0x16   :  { %940 = vmatprep.subr.bf16.mxu1 %v1045_v9  ;;  %v1061_v25 = vld [vmem:[#allocation2 + $0xc8] sm:$0xff]   ;;  %v1065_v29 = vld [vmem:[#allocation2 + $0xc0] sm:$0xff]   ;;  %v32_v34 = vld [vmem:[%s1236_s0 + $0x18] sm:$0xff] }
  0x17   :  { %v1062_v26 = vld [vmem:[#allocation2 + $0x8] sm:$0xff]   ;;  %v1066_v30 = vld [vmem:[#allocation2] sm:$0xff]   ;;  %v40_v36 = vld [vmem:[%s1236_s0 + $0x58] sm:$0xff] }
  0x18   :  { %919 = vmatpush3.bf16.msra.mxu0 %v1046_v10  ;;  %v1063_v27 = vld [vmem:[#allocation2 + $0x88] sm:$0xff]   ;;  %v1067_v31 = vld [vmem:[#allocation2 + $0x80] sm:$0xff]   ;;  %v48_v39 = vpack.c.bf16 %v40_v36, %v32_v34  ;;  %v31_v41 = vld [vmem:[%s1236_s0 + $0x10] sm:$0xff] }
  0x19   :  { %941 = vmatpush3.bf16.msra.mxu1 %v1047_v11  ;;  %920 = vmatprep.subr.bf16.mxu0 %v1048_v12  ;;  %v30_v32 = vld [vmem:[%s1236_s0 + $0x8] sm:$0xff]  ;;  %v29_v37 = vld [vmem:[%s1236_s0] sm:$0xff]  ;;  %v39_v42 = vld [vmem:[%s1236_s0 + $0x50] sm:$0xff] }
  0x1a   :  { %942 = vmatprep.subr.bf16.mxu1 %v1049_v13  ;;  %v38_v33 = vld [vmem:[%s1236_s0 + $0x48] sm:$0xff]  ;;  %v37_v38 = vld [vmem:[%s1236_s0 + $0x40] sm:$0xff]  ;;  %v47_v43 = vpack.c.bf16 %v39_v42, %v31_v41  ;;  %v1068_v44 = vld [vmem:[#allocation2 + $0x178] sm:$0xff]   ;;  %638 = vmatprep.mubr.bf16.mxu1 %v48_v39 }
  0x1b   :  { %v46_v35 = vpack.c.bf16 %v38_v33, %v30_v32  ;;  %v45_v40 = vpack.c.bf16 %v37_v38, %v29_v37  ;;  %v1069_v45 = vld [vmem:[#allocation2 + $0x1f8] sm:$0xff]   ;;  %v1072_v48 = vld [vmem:[#allocation2 + $0x170] sm:$0xff]   ;;  %v1076_v52 = vld [vmem:[#allocation2 + $0x168] sm:$0xff]  }
  0x1c   :  { %921 = vmatpush3.bf16.msra.mxu0 %v1050_v14  ;;  %v1070_v46 = vld [vmem:[#allocation2 + $0x138] sm:$0xff]   ;;  %v1073_v49 = vld [vmem:[#allocation2 + $0x1f0] sm:$0xff]   ;;  %v1077_v53 = vld [vmem:[#allocation2 + $0x1e8] sm:$0xff]  }
  0x1d   :  { %943 = vmatpush3.bf16.msra.mxu1 %v1051_v15  ;;  %922 = vmatprep.subr.bf16.mxu0 %v1052_v16  ;;  %v1071_v47 = vld [vmem:[#allocation2 + $0x1b8] sm:$0xff]   ;;  %v1074_v50 = vld [vmem:[#allocation2 + $0x130] sm:$0xff]   ;;  %v1078_v54 = vld [vmem:[#allocation2 + $0x128] sm:$0xff]  }
  0x1e   :  { %944 = vmatprep.subr.bf16.mxu1 %v1053_v17  ;;  %597 = vmatprep.mubr.bf16.mxu0 %v46_v35  ;;  %v1075_v51 = vld [vmem:[#allocation2 + $0x1b0] sm:$0xff]   ;;  %v1079_v55 = vld [vmem:[#allocation2 + $0x1a8] sm:$0xff]   ;;  %v1080_v56 = vld [vmem:[#allocation2 + $0x160] sm:$0xff]  }
  0x1f   :  { %v1081_v57 = vld [vmem:[#allocation2 + $0x1e0] sm:$0xff]   ;;  %v1084_v60 = vld [vmem:[#allocation2 + $0x158] sm:$0xff]   ;;  %v1088_v0 = vld [vmem:[#allocation2 + $0x150] sm:$0xff]  }
  0x20   :  { %923 = vmatpush3.bf16.msra.mxu0 %v1054_v18  ;;  %v1082_v58 = vld [vmem:[#allocation2 + $0x120] sm:$0xff]   ;;  %v1085_v61 = vld [vmem:[#allocation2 + $0x1d8] sm:$0xff]   ;;  %v1089_v1 = vld [vmem:[#allocation2 + $0x1d0] sm:$0xff]  }
  0x21   :  { %945 = vmatpush3.bf16.msra.mxu1 %v1055_v19  ;;  %924 = vmatprep.subr.bf16.mxu0 %v1056_v20  ;;  %v1083_v59 = vld [vmem:[#allocation2 + $0x1a0] sm:$0xff]   ;;  %v1086_v62 = vld [vmem:[#allocation2 + $0x118] sm:$0xff]   ;;  %v1090_v2 = vld [vmem:[#allocation2 + $0x110] sm:$0xff]  }
  0x22   :  { %946 = vmatprep.subr.bf16.mxu1 %v1057_v21  ;;  %v1087_v63 = vld [vmem:[#allocation2 + $0x198] sm:$0xff]   ;;  %v1091_v3 = vld [vmem:[#allocation2 + $0x190] sm:$0xff]   ;;  %v1092_v4 = vld [vmem:[#allocation2 + $0x148] sm:$0xff]  }
  0x23   :  { %v1093_v5 = vld [vmem:[#allocation2 + $0x1c8] sm:$0xff]   ;;  %v1096_v8 = vld [vmem:[#allocation2 + $0x140] sm:$0xff]   ;;  %v36_v14 = vld [vmem:[%s1236_s0 + $0x38] sm:$0xff] }
  0x24   :  { %925 = vmatpush3.bf16.msra.mxu0 %v1058_v22  ;;  %v1094_v6 = vld [vmem:[#allocation2 + $0x108] sm:$0xff]   ;;  %v1097_v9 = vld [vmem:[#allocation2 + $0x1c0] sm:$0xff]   ;;  %v44_v15 = vld [vmem:[%s1236_s0 + $0x78] sm:$0xff] }
  0x25   :  { %947 = vmatpush3.bf16.msra.mxu1 %v1059_v23  ;;  %926 = vmatprep.subr.bf16.mxu0 %v1060_v24  ;;  %v1095_v7 = vld [vmem:[#allocation2 + $0x188] sm:$0xff]   ;;  %v1098_v10 = vld [vmem:[#allocation2 + $0x100] sm:$0xff]   ;;  %v52_v17 = vpack.c.bf16 %v44_v15, %v36_v14  ;;  %v35_v20 = vld [vmem:[%s1236_s0 + $0x30] sm:$0xff] }
  0x26   :  { %948 = vmatprep.subr.bf16.mxu1 %v1061_v25  ;;  %v1099_v11 = vld [vmem:[#allocation2 + $0x180] sm:$0xff]   ;;  %v34_v12 = vld [vmem:[%s1236_s0 + $0x28] sm:$0xff]  ;;  %v43_v22 = vld [vmem:[%s1236_s0 + $0x70] sm:$0xff]  ;;  %v1133_v25 = vmov 0.0  }
  0x27   :  { %v42_v13 = vld [vmem:[%s1236_s0 + $0x68] sm:$0xff]  ;;  %v33_v18 = vld [vmem:[%s1236_s0 + $0x20] sm:$0xff]  ;;  %v51_v23 = vpack.c.bf16 %v43_v22, %v35_v20  ;;  %v1100_v24 = vld [vmem:[%s1238_s2 + $0x38] sm:$0xff]  }
  0x28   :  { %927 = vmatpush3.bf16.msra.mxu0 %v1062_v26  ;;  %v50_v16 = vpack.c.bf16 %v42_v13, %v34_v12  ;;  %v41_v19 = vld [vmem:[%s1236_s0 + $0x60] sm:$0xff]  ;;  %v1101_v26 = vld [vmem:[%s1238_s2 + $0x30] sm:$0xff]  }
  0x29   :  { %949 = vmatpush3.bf16.msra.mxu1 %v1063_v27  ;;  %928 = vmatprep.subr.bf16.mxu0 %v1064_v28  ;;  %v49_v21 = vpack.c.bf16 %v41_v19, %v33_v18  ;;  %v1102_v27 = vld [vmem:[%s1238_s2 + $0x28] sm:$0xff]   ;;  %v1103_v28 = vld [vmem:[%s1238_s2 + $0x20] sm:$0xff]  }
  0x2a   :  { %950 = vmatprep.subr.bf16.mxu1 %v1065_v29  ;;  %v1104_v29 = vld [vmem:[%s1238_s2 + $0x18] sm:$0xff]   ;;  %v1107_v32 = vld [vmem:[%s1238_s2] sm:$0xff]  }
  0x2c   :  { %929 = vmatpush3.bf16.msra.mxu0 %v1066_v30  ;;  %v1105_v30 = vld [vmem:[%s1238_s2 + $0x10] sm:$0xff]  }
  0x2d   :  { %951 = vmatpush3.bf16.msra.mxu1 %v1067_v31  ;;  %958 = vmatprep.subr.bf16.mxu0 %v1068_v44  ;;  %v1106_v31 = vld [vmem:[%s1238_s2 + $0x8] sm:$0xff]  }
  0x2e   :  { %980 = vmatprep.subr.bf16.mxu1 %v1069_v45 }
  0x2f   :  { %598 = vmatmul.mubr.bf16.vlgmr.msra.gmra.mxu0 %v45_v40 }
  0x30   :  { %639 = vmatmul.mubr.bf16.vlgmr.msra.gmra.mxu1 %v47_v43  ;;  %959 = vmatpush3.bf16.msra.mxu0 %v1070_v46 }
  0x31   :  { %981 = vmatpush3.bf16.msra.mxu1 %v1071_v47  ;;  %960 = vmatprep.subr.bf16.mxu0 %v1072_v48 }
  0x32   :  { %982 = vmatprep.subr.bf16.mxu1 %v1073_v49  ;;  %679 = vmatprep.mubr.bf16.mxu0 %v50_v16 }
  0x33   :  { %720 = vmatprep.mubr.bf16.mxu1 %v52_v17 }
  0x34   :  { %961 = vmatpush3.bf16.msra.mxu0 %v1074_v50 }
  0x35   :  { %983 = vmatpush3.bf16.msra.mxu1 %v1075_v51  ;;  %962 = vmatprep.subr.bf16.mxu0 %v1076_v52 }
  0x36   :  { %984 = vmatprep.subr.bf16.mxu1 %v1077_v53 }
  0x38   :  { %963 = vmatpush3.bf16.msra.mxu0 %v1078_v54 }
  0x39   :  { %985 = vmatpush3.bf16.msra.mxu1 %v1079_v55  ;;  %964 = vmatprep.subr.bf16.mxu0 %v1080_v56 }
  0x3a   :  { %986 = vmatprep.subr.bf16.mxu1 %v1081_v57 }
  0x3c   :  { %965 = vmatpush3.bf16.msra.mxu0 %v1082_v58 }
  0x3d   :  { %987 = vmatpush3.bf16.msra.mxu1 %v1083_v59  ;;  %966 = vmatprep.subr.bf16.mxu0 %v1084_v60 }
  0x3e   :  { %988 = vmatprep.subr.bf16.mxu1 %v1085_v61 }
  0x40   :  { %967 = vmatpush3.bf16.msra.mxu0 %v1086_v62 }
  0x41   :  { %989 = vmatpush3.bf16.msra.mxu1 %v1087_v63  ;;  %968 = vmatprep.subr.bf16.mxu0 %v1088_v0 }
  0x42   :  { %990 = vmatprep.subr.bf16.mxu1 %v1089_v1 }
  0x44   :  { %969 = vmatpush3.bf16.msra.mxu0 %v1090_v2 }
  0x45   :  { %991 = vmatpush3.bf16.msra.mxu1 %v1091_v3  ;;  %970 = vmatprep.subr.bf16.mxu0 %v1092_v4 }
  0x46   :  { %992 = vmatprep.subr.bf16.mxu1 %v1093_v5 }
  0x48   :  { %971 = vmatpush3.bf16.msra.mxu0 %v1094_v6 }
  0x49   :  { %993 = vmatpush3.bf16.msra.mxu1 %v1095_v7  ;;  %972 = vmatprep.subr.bf16.mxu0 %v1096_v8 }
  0x4a   :  { %994 = vmatprep.subr.bf16.mxu1 %v1097_v9 }
  0x4c   :  { %973 = vmatpush3.bf16.msra.mxu0 %v1098_v10 }
  0x4d   :  { %995 = vmatpush3.bf16.msra.mxu1 %v1099_v11  ;;  %1011 = vmatprep.subr.bf16.mxu0 %v1133_v25 }
  0x4f   :  { %680 = vmatmul.mubr.bf16.vlgmr.msra.gmra.mxu0 %v49_v21 }
  0x50   :  { %721 = vmatmul.mubr.bf16.vlgmr.msra.gmra.mxu1 %v51_v23  ;;  %1012 = vmatpush3.bf16.msra.mxu0 %v1100_v24 }
  0x51   :  { %1013 = vmatprep.subr.bf16.mxu0 %v1133_v25  ;;  %1027 = vmatprep.mubr.msk.bf16.mxu0 %vm1134_vm0, %v1133_v25 }
  0x54   :  { %1014 = vmatpush3.bf16.msra.mxu0 %v1101_v26 }
  0x55   :  { %1015 = vmatprep.subr.bf16.mxu0 %v1133_v25 }
  0x58   :  { %1016 = vmatpush3.bf16.msra.mxu0 %v1102_v27 }
  0x59   :  { %1017 = vmatprep.subr.bf16.mxu0 %v1133_v25 }
  0x5c   :  { %1018 = vmatpush3.bf16.msra.mxu0 %v1103_v28 }
  0x5d   :  { %1019 = vmatprep.subr.bf16.mxu0 %v1133_v25 }
  0x60   :  { %1020 = vmatpush3.bf16.msra.mxu0 %v1104_v29 }
  0x61   :  { %1021 = vmatprep.subr.bf16.mxu0 %v1133_v25 }
  0x64   :  { %1022 = vmatpush3.bf16.msra.mxu0 %v1105_v30 }
  0x65   :  { %1023 = vmatprep.subr.bf16.mxu0 %v1133_v25 }
  0x68   :  { %1024 = vmatpush3.bf16.msra.mxu0 %v1106_v31 }
  0x69   :  { %1025 = vmatprep.subr.bf16.mxu0 %v1133_v25 }
  0x6c   :  { %1026 = vmatpush3.bf16.msra.mxu0 %v1107_v32 }
  0xef   :  { %v930_v33 = vpop.f32.mrf.mxu0 }
  0xf0   :  { %v952_v34 = vpop.f32.mrf.mxu1 }
  0xf1   :  { %v931_v35 = vpop.f32.mrf.mxu0 }
  0xf2   :  { %v953_v36 = vpop.f32.mrf.mxu1  ;;  %v932_v42 = vadd.f32 %v931_v35, %v930_v33 }
  0xf3   :  { %v933_v37 = vpop.f32.mrf.mxu0  ;;  %v954_v43 = vadd.f32 %v953_v36, %v952_v34 }
  0xf4   :  { %v955_v38 = vpop.f32.mrf.mxu1 }
  0xf5   :  { %v934_v39 = vpop.f32.mrf.mxu0  ;;  %v641_v51 = vadd.f32 %v954_v43, %v932_v42 }
  0xf6   :  { %v956_v40 = vpop.f32.mrf.mxu1  ;;  %v935_v46 = vadd.f32 %v934_v39, %v933_v37 }
  0xf7   :  { %v957_v47 = vadd.f32 %v956_v40, %v955_v38 }
  0xf9   :  { %v644_v54 = vadd.f32 %v957_v47, %v935_v46 }
 0x10f   :  { %v974_v41 = vpop.f32.mrf.mxu0 }
 0x110   :  { %v996_v44 = vpop.f32.mrf.mxu1 }
 0x111   :  { %v975_v45 = vpop.f32.mrf.mxu0 }
 0x112   :  { %v976_v48 = vadd.f32 %v975_v45, %v974_v41  ;;  %v997_v49 = vpop.f32.mrf.mxu1 }
 0x113   :  { %v977_v50 = vpop.f32.mrf.mxu0  ;;  %v998_v58 = vadd.f32 %v997_v49, %v996_v44 }
 0x114   :  { %v999_v52 = vpop.f32.mrf.mxu1  ;;  %v682_v55 = vadd.f32 %v976_v48, %v641_v51 }
 0x115   :  { %v978_v53 = vpop.f32.mrf.mxu0 }
 0x116   :  { %v979_v56 = vadd.f32 %v978_v53, %v977_v50  ;;  %v1000_v57 = vpop.f32.mrf.mxu1  ;;  %v723_v61 = vadd.f32 %v998_v58, %v682_v55 }
 0x117   :  { %v1001_v60 = vadd.f32 %v1000_v57, %v999_v52 }
 0x118   :  { %v685_v59 = vadd.f32 %v979_v56, %v644_v54 }
 0x11a   :  { %v726_v62 = vadd.f32 %v1001_v60, %v685_v59 }
 0x11c   :  { %v729_v63 = vpack.c.bf16 %v726_v62, %v723_v61 }
 0x11e   :  { %1028 = vmatmul.mubr.bf16.vlgmr.msra.gmra.mxu0 %v729_v63 }
 0x1de   :  { %v828_v0 = vpop.f32.mrf.mxu0 }
 0x1df   :  { %835 = vst [vmem:[%s1239_s3] sm:$0xff] %v828_v0 }
 0x1e0   :  { %v1029_v1 = vpop.f32.mrf.mxu0 }
 0x1e2   :  { %v831_v2 = vpop.f32.mrf.mxu0 }
 0x1e3   :  { %836 = vst [vmem:[%s1239_s3 + $0x8] sm:$0xff] %v831_v2 }
 0x1e4   :  { %v1030_v3 = vpop.f32.mrf.mxu0 }
 0x1e5   :  { %841 = vsyncpa [#allocation3], 1 }

</bundles_post_ra>
